<compile_context>
chip_gen: v5e
topology: v5e:2x2
jax: 0.10.0
libtpu: 0.0.40
codegen_flags: <defaults>
</compile_context>

<pallas_src>
import jax
import jax.numpy as jnp
from jax.experimental import pallas as pl
from jax.experimental.pallas import tpu as pltpu

IN_DIM = 10
HID_DIM = 10
# Packed parameter buffer layout (rows of a (13, HID_DIM) f32 array):
#   rows [0, 10)  : w1^T   (in, out)
#   row  10       : b1
#   row  11       : w2
#   row  12, col 0: b2     (rest of the row is zero padding)
_PACK_ROWS = IN_DIM + 3
_MAX_BLOCK_B = 1024  # multiple of 8; bounds VMEM footprint (v7x-safe) once B scales up


def mlp_kernel(x_ref, p_ref, o_ref):
    x = x_ref[...]                                   # (block_b, 10)  VMEM
    w1t = p_ref[0:IN_DIM, :]                         # (10, 10) static sublane slice
    b1 = p_ref[IN_DIM:IN_DIM + 1, :]                 # (1, 10)
    w2 = p_ref[IN_DIM + 1:IN_DIM + 2, :]             # (1, 10)
    b2 = p_ref[IN_DIM + 2:IN_DIM + 3, 0:1]           # (1, 1)

    # Linear 1: x @ W1^T + b1 -> single MXU push, f32 accumulation, no in-kernel transpose.
    h = jnp.dot(x, w1t, preferred_element_type=jnp.float32) + b1
    # ReLU on the VPU.
    h = jnp.maximum(h, 0.0)
    # Linear 2 (out_features=1): VPU multiply + cross-lane (XLU) sum instead of an N=1 matmul.
    y = jnp.sum(h * w2, axis=-1, keepdims=True) + b2
    # (block_b, 1) output; pad to a lane-dense (block_b, 128) slab if the output width scales.
    o_ref[...] = y.astype(o_ref.dtype)


class DataParallelBucketForward:
    """Forward pass of DataParallelBucket (== wrapped MLP).  Params packed once at init."""

    def __init__(self, w1, b1, w2, b2, block_b=None):
        # One-time layout plumbing (hoisted out of the per-call path).
        b2_row = jnp.zeros((1, HID_DIM), jnp.float32).at[0, 0].set(b2.reshape(()).astype(jnp.float32))
        self.packed = jnp.concatenate(
            [
                jnp.transpose(w1).astype(jnp.float32),        # (10, 10) (in, out)
                b1.reshape(1, HID_DIM).astype(jnp.float32),   # (1, 10)
                w2.reshape(1, HID_DIM).astype(jnp.float32),   # (1, 10)
                b2_row,                                        # (1, 10)
            ],
            axis=0,
        )  # (13, 10)
        assert self.packed.shape == (_PACK_ROWS, HID_DIM)
        self.block_b = block_b

    def _choose_block_b(self, B):
        if self.block_b is not None:
            return self.block_b
        # Single tile for small batches (block == full array dims -> always layout-legal);
        # bounded multiple-of-8 tiles once B grows (pipelined x DMAs, megacore-splittable).
        return B if B <= _MAX_BLOCK_B else _MAX_BLOCK_B

    def __call__(self, x):
        B = x.shape[0]
        block_b = self._choose_block_b(B)
        grid = (pl.cdiv(B, block_b),)
        return pl.pallas_call(
            mlp_kernel,
            out_shape=jax.ShapeDtypeStruct((B, 1), x.dtype),
            grid=grid,
            in_specs=[
                pl.BlockSpec((block_b, IN_DIM), lambda i: (i, 0)),        # x: batch-tiled
                pl.BlockSpec((_PACK_ROWS, HID_DIM), lambda i: (0, 0)),    # params: resident
            ],
            out_specs=pl.BlockSpec((block_b, 1), lambda i: (i, 0)),
            compiler_params=pltpu.CompilerParams(
                dimension_semantics=("parallel",),
            ),
        )(x, self.packed)


def reference_forward(x, w1, b1, w2, b2):
    h = jnp.maximum(x @ w1.T + b1, 0.0)
    return h @ w2.T + b2


if __name__ == "__main__":
    key = jax.random.PRNGKey(0)
    k_x, k_w1, k_b1, k_w2, k_b2 = jax.random.split(key, 5)

    bound1 = 1.0 / jnp.sqrt(float(IN_DIM))
    w1 = jax.random.uniform(k_w1, (HID_DIM, IN_DIM), jnp.float32, -bound1, bound1)
    b1 = jax.random.uniform(k_b1, (HID_DIM,), jnp.float32, -bound1, bound1)
    w2 = jax.random.uniform(k_w2, (1, HID_DIM), jnp.float32, -bound1, bound1)
    b2 = jax.random.uniform(k_b2, (1,), jnp.float32, -bound1, bound1)

    model = DataParallelBucketForward(w1, b1, w2, b2)

    # Small-shape check (single tile, gridless-equivalent).
    B = 8
    x = jax.random.normal(k_x, (B, IN_DIM), jnp.float32)
    out = jax.block_until_ready(model(x))
    ref = reference_forward(x, w1, b1, w2, b2)
    assert out.shape == (B, 1), out.shape
    assert jnp.allclose(out, ref, atol=1e-5, rtol=1e-5), (out, ref)

    # Multi-tile batch-grid check (exercises the pipelined / megacore-splittable path).
    B2 = 2048
    x2 = jax.random.normal(k_x, (B2, IN_DIM), jnp.float32)
    model2 = DataParallelBucketForward(w1, b1, w2, b2, block_b=512)
    out2 = jax.block_until_ready(model2(x2))
    ref2 = reference_forward(x2, w1, b1, w2, b2)
    assert out2.shape == (B2, 1), out2.shape
    assert jnp.allclose(out2, ref2, atol=1e-5, rtol=1e-5)

    print("KERNEL_OK")
</pallas_src>

<mosaic_0001>
module attributes {stable_mosaic.version = 11 : i64} {
  func.func @mlp_kernel(%arg0: i32, %arg1: memref<8x10xf32, #tpu.memory_space<vmem>>, %arg2: memref<13x10xf32, #tpu.memory_space<vmem>>, %arg3: memref<8x1xf32, #tpu.memory_space<vmem>>) attributes {dimension_semantics = [#tpu.dimension_semantics<parallel>], iteration_bounds = array<i64: 1>, scalar_prefetch = 0 : i64, scratch_operands = 0 : i64, tpu.core_type = #tpu.core_type<tc>, window_params = [{transform_indices = @transform_0, window_bounds = array<i64: 8, 10>}, {pipeline_mode = #tpu.pipeline_mode<synchronous>, transform_indices = @transform_1, window_bounds = array<i64: 13, 10>}, {transform_indices = @transform_2, window_bounds = array<i64: 8, 1>}]} {
    %c0 = arith.constant 0 : index
    %c0_0 = arith.constant 0 : index
    %0 = vector.load %arg1[%c0, %c0_0] : memref<8x10xf32, #tpu.memory_space<vmem>>, vector<8x10xf32>
    %c0_1 = arith.constant 0 : index
    %c0_2 = arith.constant 0 : index
    %1 = vector.load %arg2[%c0_1, %c0_2] : memref<13x10xf32, #tpu.memory_space<vmem>>, vector<10x10xf32>
    %c10 = arith.constant 10 : index
    %c0_3 = arith.constant 0 : index
    %2 = vector.load %arg2[%c10, %c0_3] : memref<13x10xf32, #tpu.memory_space<vmem>>, vector<1x10xf32>
    %c11 = arith.constant 11 : index
    %c0_4 = arith.constant 0 : index
    %3 = vector.load %arg2[%c11, %c0_4] : memref<13x10xf32, #tpu.memory_space<vmem>>, vector<1x10xf32>
    %c12 = arith.constant 12 : index
    %c0_5 = arith.constant 0 : index
    %4 = vector.load %arg2[%c12, %c0_5] : memref<13x10xf32, #tpu.memory_space<vmem>>, vector<1x1xf32>
    %cst = arith.constant dense<0.000000e+00> : vector<8x10xf32>
    %5 = tpu.matmul %0, %1, %cst {dimension_numbers = #tpu.dot_dimension_numbers<[1], [0], [0], [1], [0, 0, 1, 1], [], []>} : vector<8x10xf32>, vector<10x10xf32>, vector<8x10xf32> -> vector<8x10xf32>
    %6 = vector.broadcast %2 : vector<1x10xf32> to vector<8x10xf32>
    %7 = arith.addf %5, %6 : vector<8x10xf32>
    %cst_6 = arith.constant 0.000000e+00 : f32
    %8 = vector.broadcast %cst_6 : f32 to vector<8x10xf32>
    %9 = arith.maximumf %7, %8 : vector<8x10xf32>
    %10 = vector.broadcast %3 : vector<1x10xf32> to vector<8x10xf32>
    %11 = arith.mulf %9, %10 : vector<8x10xf32>
    %cst_7 = arith.constant dense<0.000000e+00> : vector<8xf32>
    %12 = vector.multi_reduction <add>, %11, %cst_7 [1] : vector<8x10xf32> to vector<8xf32>
    %13 = vector.shape_cast %12 : vector<8xf32> to vector<8x1xf32>
    %14 = vector.broadcast %4 : vector<1x1xf32> to vector<8x1xf32>
    %15 = arith.addf %13, %14 : vector<8x1xf32>
    %c0_8 = arith.constant 0 : index
    %c0_9 = arith.constant 0 : index
    %16 = vector.load %arg3[%c0_8, %c0_9] : memref<8x1xf32, #tpu.memory_space<vmem>>, vector<8x1xf32>
    tpu.vector_store %arg3[%c0_8, %c0_9], %15 {strides = array<i32>} : memref<8x1xf32, #tpu.memory_space<vmem>>, vector<8x1xf32>,
    return
  }
  func.func @transform_0(%arg0: i32) -> (i32, i32) {
    %c0_i32 = arith.constant 0 : i32
    %c0_i32_0 = arith.constant 0 : i32
    return %arg0, %c0_i32 : i32, i32
  }
  func.func @transform_1(%arg0: i32) -> (i32, i32) {
    %c0_i32 = arith.constant 0 : i32
    %c0_i32_0 = arith.constant 0 : i32
    %c0_i32_1 = arith.constant 0 : i32
    return %c0_i32, %c0_i32_0 : i32, i32
  }
  func.func @transform_2(%arg0: i32) -> (i32, i32) {
    %c0_i32 = arith.constant 0 : i32
    %c0_i32_0 = arith.constant 0 : i32
    return %arg0, %c0_i32 : i32, i32
  }
}

</mosaic_0001>

<bundles_post_ra>
// kernel: tpu_custom_call.1
= control target key start
LH: loop header
LB: loop body
LE: loop exit
PB: predicated region body
PF: predicated region fallthrough
CT: control target
= control target key end

     0   :  { %7 = vsyncpa [#allocation3], 0  ;;  %s181_s0 = inlined_call_operand.hbm [shape: f32[8,10], index: 0, kind: input, shape index: {}]   ;;  %s182_s1 = inlined_call_operand.hbm [shape: f32[13,10], index: 1, kind: input, shape index: {}]   ;;  %s183_s2 = inlined_call_operand.vmem [shape: f32[8,1], index: 2, kind: output, shape index: {}]  }
   0x1   :  { %s14_s11 = sshll.u32 %s181_s0, 4  ;;  %s15_s11 = int_to_ptr.hbm [resolvable:$true] %s14_s11 }
   0x2   :  { %8 = vsyncpa [#allocation5], 0  ;;  %s153_s12 = smov [#allocation2]   ;;  %s24_s16 = sshll.u32 %s182_s1, 4  ;;  %s25_s16 = int_to_ptr.hbm [resolvable:$true] %s24_s16 }
   0x3   :  { %s16_s13 = sshll.u32 %s153_s12, 4  ;;  %s154_s17 = smov [#allocation4]   ;;  %s17_s13 = int_to_ptr.vmem [resolvable:$true] %s16_s13 }
   0x4   :  { %19 = dma.hbm_to_vmem [thread:$0]  %s15_s11, 128, %s17_s13, [#allocation3]  }
   0x5   :  { %s26_s18 = sshll.u32 %s154_s17, 4  ;;  %s155_s19 = smov 128   ;;  %s27_s18 = int_to_ptr.vmem [resolvable:$true] %s26_s18 }
   0x6   :  { %s156_s20 = smov 8  }
   0x7   :  { %32 = dma.hbm_to_vmem [thread:$0]  %s25_s16, 256, %s27_s18, [#allocation5], %s155_s19, %s155_s19, %s156_s20  }
   0x8   :  { %149 = dma.done.wait [#allocation3], 128  }
   0x9   :  { %150 = vsyncadd [#allocation3], 4294967168 }
   0xa   :  { %151 = dma.done.wait [#allocation5], 256  }
   0xb   :  { %152 = vsyncadd [#allocation5], 4294967040  ;;  %vm52_vm0 = vcmask 1041408   ;;  %v43_v0 = vld [vmem:[#allocation4 + $0x8] sm:$0x3]  ;;  %v42_v1 = vld [vmem:[#allocation4] sm:$0xff] }
   0xc   :  { %92 = vmatpush.msk.msra.mxu0 %vm52_vm0, %v43_v0  ;;  %v41_v2 = vld [vmem:[#allocation2] sm:$0xff]  ;;  %vm48_vm1 = vcmask 80896   ;;  %v98_v3 = vld [vmem:[#allocation4 + $0xa] ss:$0 sm:$0xff]  ;;  %v99_v6 = vld [vmem:[#allocation4 + $0xb] ss:$0 sm:$0xff] }
   0xd   :  { %v100_v10 = vld [vmem:[#allocation4 + $0xc] ss:$0 sm:$0xff]  ;;  %vm84_vm2 = vcmask 7168  }
   0xe   :  { %71 = vmatpush.msra.mxu0 %v42_v1 }
   0xf   :  { %93 = vmatmul.msk.f32.vlgmr.msra.gmra.mxu0 %vm48_vm1, %v41_v2 }
  0x8c   :  { %v73_v4 = vpop.f32.mrf.mxu0 }
  0x8d   :  { %v74_v5 = vadd.f32 %v98_v3, %v73_v4 }
  0x8f   :  { %v76_v7 = vmax.f32 %v74_v5, 0.0 }
  0x91   :  { %v78_v8 = vmul.f32 %v99_v6, %v76_v7 }
  0x93   :  { %v79_v9 = vsel %vm48_vm1, %v78_v8, 0.0 }
  0x94   :  { %80 = vadd.xlane.f32.xlu0 %v79_v9 }
 0x107   :  { %v81_v11 = vpop.xlane.xlu0 %80 }
 0x108   :  { %v83_v12 = vadd.f32 %v100_v10, %v81_v11 }
 0x10a   :  { %85 = vst.msk [vmem:[%s183_s2] sm:$0xff] %vm84_vm2, %v83_v12 }
 0x10b   :  { %90 = vsyncpa [#allocation3], 1 }
 0x10c   :  { %91 = vsyncpa [#allocation5], 1 }

</bundles_post_ra>
